<compile_context>
chip_gen: v6e
topology: v6e:2x2x1
jax: 0.10.0
libtpu: 0.0.40
codegen_flags: <defaults>
</compile_context>

<pallas_src>
import jax
import jax.numpy as jnp
from jax.experimental import pallas as pl
from jax.experimental.pallas import tpu as pltpu

BN_EPS = 1e-5


# ----------------------------- pass 1 kernel --------------------------------
def _pre_bn_kernel(g_ref, p_ref, w1g_ref, w1p_ref, h_ref, sum_ref, sq_ref):
    """h = p @ W1p + repeat_K(g @ W1g); emit per-tile sum / sum-of-squares."""
    tn = p_ref.shape[0]            # p rows in this tile
    gt = g_ref.shape[0]            # g rows in this tile  (tn == gt * K)
    k = tn // gt

    # g half of l1, computed once per g row (B*D*D FLOPs total, K x less).
    gh = jnp.dot(g_ref[...], w1g_ref[...], preferred_element_type=jnp.float32)

    # Expand each g-row result to its K consecutive p rows with a one-hot
    # matmul (built on the VPU, applied on the MXU).  Avoids in-kernel
    # concat / repeat / gather layout shuffles entirely.
    rows = jax.lax.broadcasted_iota(jnp.int32, (tn, gt), 0)
    cols = jax.lax.broadcasted_iota(jnp.int32, (tn, gt), 1)
    lo = cols * k
    onehot = jnp.logical_and(rows >= lo, rows < lo + k).astype(jnp.float32)
    gh_rep = jnp.dot(onehot, gh, preferred_element_type=jnp.float32)  # (tn, D)

    # p half of l1.  (l1 bias omitted: it cancels inside BatchNorm.)
    h = jnp.dot(p_ref[...], w1p_ref[...], preferred_element_type=jnp.float32)
    h = h + gh_rep
    h_ref[...] = h

    # Per-tile BatchNorm statistics (combined across tiles in the wrapper).
    sum_ref[0] = jnp.sum(h, axis=0, keepdims=True)
    sq_ref[0] = jnp.sum(h * h, axis=0, keepdims=True)


# ----------------------------- pass 2 kernel --------------------------------
def _bn_relu_l2_kernel(h_ref, scale_ref, shift_ref, w2_ref, b2_ref, out_ref):
    """out = relu(h * scale + shift) . w2 + b2  (w2 applied as lane reduce)."""
    hn = jnp.maximum(h_ref[...] * scale_ref[...] + shift_ref[...], 0.0)
    # D -> 1 "matmul" as elementwise multiply + lane reduction: keeps the MXU
    # out of this purely streaming pass.
    r = jnp.sum(hn * w2_ref[...], axis=1, keepdims=True)          # (tn, 1)
    out_ref[...] = r + b2_ref[0]


# ------------------------------- wrapper -------------------------------------
def _pick_rows(n, multiple, target):
    """Largest tile <= target that divides n and is a multiple of `multiple`;
    falls back to n (single tile) if no such divisor exists."""
    best = None
    d = multiple
    while d <= min(n, target):
        if n % d == 0:
            best = d
        d += multiple
    return best if best is not None else n


@jax.jit
def cat_linear_forward(g_vec, p_vec, w1, b1, gamma, beta, w2, b2):
    """g_vec: (B, D), p_vec: (B*K, D). Weights pre-transposed to (in, out).
    Returns (B*K, 1), matching the PyTorch module's training-mode forward."""
    del b1  # l1 bias cancels exactly under BatchNorm's mean subtraction.
    B, D = g_vec.shape
    N = p_vec.shape[0]
    assert N % B == 0, "p_vec rows must be a multiple of g_vec rows"
    K = N // B

    w1g = w1[:D, :]   # acts on the repeated-g half of the (virtual) concat
    w1p = w1[D:, :]   # acts on the p half

    # ---------------- pass 1: split l1 + BN statistics ----------------
    # Tile must be a multiple of 8*K rows (so the g block is 8-row aligned);
    # cap at min(512, 64*K) rows so the one-hot expansion stays tiny.
    tn1 = _pick_rows(N, 8 * K, min(512, 64 * K))
    nt1 = N // tn1
    gt1 = tn1 // K

    h, tsum, tsq = pl.pallas_call(
        _pre_bn_kernel,
        out_shape=(
            jax.ShapeDtypeStruct((N, D), jnp.float32),
            jax.ShapeDtypeStruct((nt1, 1, D), jnp.float32),
            jax.ShapeDtypeStruct((nt1, 1, D), jnp.float32),
        ),
        grid=(nt1,),
        in_specs=[
            pl.BlockSpec((gt1, D), lambda i: (i, 0)),       # g rows of tile i
            pl.BlockSpec((tn1, D), lambda i: (i, 0)),       # p rows of tile i
            pl.BlockSpec((D, D), lambda i: (0, 0)),         # w1g (resident)
            pl.BlockSpec((D, D), lambda i: (0, 0)),         # w1p (resident)
        ],
        out_specs=(
            pl.BlockSpec((tn1, D), lambda i: (i, 0)),       # h (pre-BN)
            pl.BlockSpec((1, 1, D), lambda i: (i, 0, 0)),   # per-tile sum
            pl.BlockSpec((1, 1, D), lambda i: (i, 0, 0)),   # per-tile sum sq
        ),
        compiler_params=pltpu.CompilerParams(
            dimension_semantics=("parallel",)),
    )(g_vec, p_vec, w1g, w1p)

    # ------------- tiny (D,)-sized stat combine + BN folding (XLA) -------------
    mean = jnp.sum(tsum[:, 0, :], axis=0) / N                    # (D,)
    var = jnp.sum(tsq[:, 0, :], axis=0) / N - mean * mean        # biased var
    inv = jax.lax.rsqrt(var + BN_EPS)
    scale = gamma.reshape(-1) * inv                              # (D,)
    shift = beta.reshape(-1) - mean * scale                      # (D,)
    # TODO(synk): PyTorch BatchNorm1d also updates running_mean/running_var in
    # training mode; those state buffers are not produced here.

    # ---------------- pass 2: BN affine + ReLU + l2 ----------------
    tn2 = _pick_rows(N, 8, 1024)
    nt2 = N // tn2

    out = pl.pallas_call(
        _bn_relu_l2_kernel,
        out_shape=jax.ShapeDtypeStruct((N, 1), jnp.float32),
        grid=(nt2,),
        in_specs=[
            pl.BlockSpec((tn2, D), lambda i: (i, 0)),       # h tile
            pl.BlockSpec((1, D), lambda i: (0, 0)),         # BN scale (resident)
            pl.BlockSpec((1, D), lambda i: (0, 0)),         # BN shift (resident)
            pl.BlockSpec((1, D), lambda i: (0, 0)),         # w2 as a row
            pl.BlockSpec(memory_space=pltpu.MemorySpace.SMEM),  # b2 scalar
        ],
        out_specs=pl.BlockSpec((tn2, 1), lambda i: (i, 0)),
        compiler_params=pltpu.CompilerParams(
            dimension_semantics=("parallel",)),
    )(h, scale.reshape(1, D), shift.reshape(1, D), w2.reshape(1, D),
      b2.reshape(1))

    return out


# ------------------------- params & pure-JAX reference -----------------------
def init_params(key, dim):
    """l1/l2 weights: kaiming_normal_; biases: PyTorch Linear default uniform;
    bn: gamma=1, beta=0.  Weights stored pre-transposed as (in, out)."""
    k1, k2, k3, k4 = jax.random.split(key, 4)
    fan1 = 2 * dim
    w1 = jax.random.normal(k1, (fan1, dim), jnp.float32) * jnp.sqrt(2.0 / fan1)
    b1 = jax.random.uniform(k2, (1, dim), jnp.float32,
                            -1.0 / jnp.sqrt(fan1), 1.0 / jnp.sqrt(fan1))
    fan2 = dim
    w2 = jax.random.normal(k3, (fan2, 1), jnp.float32) * jnp.sqrt(2.0 / fan2)
    b2 = jax.random.uniform(k4, (1, 1), jnp.float32,
                            -1.0 / jnp.sqrt(fan2), 1.0 / jnp.sqrt(fan2))
    gamma = jnp.ones((1, dim), jnp.float32)
    beta = jnp.zeros((1, dim), jnp.float32)
    return w1, b1, gamma, beta, w2, b2


def reference_forward(g_vec, p_vec, w1, b1, gamma, beta, w2, b2):
    """Pure-JAX reference (mirrors the PyTorch module, incl. the l1 bias)."""
    B, D = g_vec.shape
    K = p_vec.shape[0] // B
    y = jnp.repeat(g_vec, K, axis=0)
    x = jnp.concatenate([y, p_vec], axis=1)
    h = x @ w1 + b1
    mean = jnp.mean(h, axis=0, keepdims=True)
    var = jnp.mean((h - mean) ** 2, axis=0, keepdims=True)
    h = (h - mean) / jnp.sqrt(var + BN_EPS) * gamma + beta
    h = jnp.maximum(h, 0.0)
    return h @ w2 + b2


if __name__ == "__main__":
    key = jax.random.PRNGKey(0)
    dim = 32            # self.dim (e.g. args.nFeats, not bidirectional)
    B = 2               # number of g vectors
    K = 4               # negative_samples + 1  (p rows per g row)
    N = B * K

    kg, kp, kparams = jax.random.split(key, 3)
    g_vec = jax.random.normal(kg, (B, dim), jnp.float32)
    p_vec = jax.random.normal(kp, (N, dim), jnp.float32)
    params = init_params(kparams, dim)

    out = cat_linear_forward(g_vec, p_vec, *params)
    out = jax.block_until_ready(out)

    ref = reference_forward(g_vec, p_vec, *params)
    assert out.shape == (N, 1)
    assert jnp.allclose(out, ref, atol=1e-3, rtol=1e-3), (
        "mismatch vs reference: max abs err = "
        f"{float(jnp.max(jnp.abs(out - ref)))}")

    print("KERNEL_OK")
</pallas_src>

<mosaic_0001>
module attributes {stable_mosaic.version = 11 : i64} {
  func.func @_pre_bn_kernel(%arg0: i32, %arg1: memref<2x32xf32, #tpu.memory_space<vmem>>, %arg2: memref<8x32xf32, #tpu.memory_space<vmem>>, %arg3: memref<32x32xf32, #tpu.memory_space<vmem>>, %arg4: memref<32x32xf32, #tpu.memory_space<vmem>>, %arg5: memref<8x32xf32, #tpu.memory_space<vmem>>, %arg6: memref<1x1x32xf32, #tpu.memory_space<vmem>>, %arg7: memref<1x1x32xf32, #tpu.memory_space<vmem>>) attributes {dimension_semantics = [#tpu.dimension_semantics<parallel>], iteration_bounds = array<i64: 1>, scalar_prefetch = 0 : i64, scratch_operands = 0 : i64, tpu.core_type = #tpu.core_type<tc>, window_params = [{transform_indices = @transform_0, window_bounds = array<i64: 2, 32>}, {transform_indices = @transform_1, window_bounds = array<i64: 8, 32>}, {pipeline_mode = #tpu.pipeline_mode<synchronous>, transform_indices = @transform_2, window_bounds = array<i64: 32, 32>}, {pipeline_mode = #tpu.pipeline_mode<synchronous>, transform_indices = @transform_3, window_bounds = array<i64: 32, 32>}, {transform_indices = @transform_4, window_bounds = array<i64: 8, 32>}, {transform_indices = @transform_5, window_bounds = array<i64: 1, 1, 32>}, {transform_indices = @transform_6, window_bounds = array<i64: 1, 1, 32>}]} {
    %c0 = arith.constant 0 : index
    %c0_0 = arith.constant 0 : index
    %0 = vector.load %arg1[%c0, %c0_0] : memref<2x32xf32, #tpu.memory_space<vmem>>, vector<2x32xf32>
    %c0_1 = arith.constant 0 : index
    %c0_2 = arith.constant 0 : index
    %1 = vector.load %arg3[%c0_1, %c0_2] : memref<32x32xf32, #tpu.memory_space<vmem>>, vector<32x32xf32>
    %cst = arith.constant dense<0.000000e+00> : vector<2x32xf32>
    %2 = tpu.matmul %0, %1, %cst {dimension_numbers = #tpu.dot_dimension_numbers<[1], [0], [0], [1], [0, 0, 1, 1], [], []>} : vector<2x32xf32>, vector<32x32xf32>, vector<2x32xf32> -> vector<2x32xf32>
    %3 = tpu.iota {dimensions = array<i32: 0>} : vector<8x2xi32>
    %4 = tpu.iota {dimensions = array<i32: 1>} : vector<8x2xi32>
    %c4_i32 = arith.constant 4 : i32
    %5 = vector.broadcast %c4_i32 : i32 to vector<8x2xi32>
    %6 = arith.muli %4, %5 : vector<8x2xi32>
    %7 = arith.cmpi sge, %3, %6 : vector<8x2xi32>
    %c4_i32_3 = arith.constant 4 : i32
    %8 = vector.broadcast %c4_i32_3 : i32 to vector<8x2xi32>
    %9 = arith.addi %6, %8 : vector<8x2xi32>
    %10 = arith.cmpi slt, %3, %9 : vector<8x2xi32>
    %11 = arith.andi %7, %10 : vector<8x2xi1>
    %12 = arith.extui %11 : vector<8x2xi1> to vector<8x2xi32>
    %13 = arith.sitofp %12 : vector<8x2xi32> to vector<8x2xf32>
    %cst_4 = arith.constant dense<0.000000e+00> : vector<8x32xf32>
    %14 = tpu.matmul %13, %2, %cst_4 {dimension_numbers = #tpu.dot_dimension_numbers<[1], [0], [0], [1], [0, 0, 1, 1], [], []>} : vector<8x2xf32>, vector<2x32xf32>, vector<8x32xf32> -> vector<8x32xf32>
    %c0_5 = arith.constant 0 : index
    %c0_6 = arith.constant 0 : index
    %15 = vector.load %arg2[%c0_5, %c0_6] : memref<8x32xf32, #tpu.memory_space<vmem>>, vector<8x32xf32>
    %c0_7 = arith.constant 0 : index
    %c0_8 = arith.constant 0 : index
    %16 = vector.load %arg4[%c0_7, %c0_8] : memref<32x32xf32, #tpu.memory_space<vmem>>, vector<32x32xf32>
    %cst_9 = arith.constant dense<0.000000e+00> : vector<8x32xf32>
    %17 = tpu.matmul %15, %16, %cst_9 {dimension_numbers = #tpu.dot_dimension_numbers<[1], [0], [0], [1], [0, 0, 1, 1], [], []>} : vector<8x32xf32>, vector<32x32xf32>, vector<8x32xf32> -> vector<8x32xf32>
    %18 = arith.addf %17, %14 : vector<8x32xf32>
    %c0_10 = arith.constant 0 : index
    %c0_11 = arith.constant 0 : index
    %19 = vector.load %arg5[%c0_10, %c0_11] : memref<8x32xf32, #tpu.memory_space<vmem>>, vector<8x32xf32>
    tpu.vector_store %arg5[%c0_10, %c0_11], %18 {strides = array<i32>} : memref<8x32xf32, #tpu.memory_space<vmem>>, vector<8x32xf32>,
    %cst_12 = arith.constant dense<0.000000e+00> : vector<32xf32>
    %20 = vector.multi_reduction <add>, %18, %cst_12 [0] : vector<8x32xf32> to vector<32xf32>
    %21 = vector.shape_cast %20 : vector<32xf32> to vector<1x32xf32>
    %c0_13 = arith.constant 0 : index
    %c0_14 = arith.constant 0 : index
    %c0_15 = arith.constant 0 : index
    %22 = vector.load %arg6[%c0_13, %c0_14, %c0_15] : memref<1x1x32xf32, #tpu.memory_space<vmem>>, vector<1x1x32xf32>
    %23 = vector.shape_cast %22 : vector<1x1x32xf32> to vector<1x32xf32>
    %24 = vector.shape_cast %21 : vector<1x32xf32> to vector<1x1x32xf32>
    tpu.vector_store %arg6[%c0_13, %c0_14, %c0_15], %24 {strides = array<i32>} : memref<1x1x32xf32, #tpu.memory_space<vmem>>, vector<1x1x32xf32>,
    %25 = arith.mulf %18, %18 : vector<8x32xf32>
    %cst_16 = arith.constant dense<0.000000e+00> : vector<32xf32>
    %26 = vector.multi_reduction <add>, %25, %cst_16 [0] : vector<8x32xf32> to vector<32xf32>
    %27 = vector.shape_cast %26 : vector<32xf32> to vector<1x32xf32>
    %c0_17 = arith.constant 0 : index
    %c0_18 = arith.constant 0 : index
    %c0_19 = arith.constant 0 : index
    %28 = vector.load %arg7[%c0_17, %c0_18, %c0_19] : memref<1x1x32xf32, #tpu.memory_space<vmem>>, vector<1x1x32xf32>
    %29 = vector.shape_cast %28 : vector<1x1x32xf32> to vector<1x32xf32>
    %30 = vector.shape_cast %27 : vector<1x32xf32> to vector<1x1x32xf32>
    tpu.vector_store %arg7[%c0_17, %c0_18, %c0_19], %30 {strides = array<i32>} : memref<1x1x32xf32, #tpu.memory_space<vmem>>, vector<1x1x32xf32>,
    return
  }
  func.func @transform_0(%arg0: i32) -> (i32, i32) {
    %c0_i32 = arith.constant 0 : i32
    %c0_i32_0 = arith.constant 0 : i32
    return %arg0, %c0_i32 : i32, i32
  }
  func.func @transform_1(%arg0: i32) -> (i32, i32) {
    %c0_i32 = arith.constant 0 : i32
    %c0_i32_0 = arith.constant 0 : i32
    return %arg0, %c0_i32 : i32, i32
  }
  func.func @transform_2(%arg0: i32) -> (i32, i32) {
    %c0_i32 = arith.constant 0 : i32
    %c0_i32_0 = arith.constant 0 : i32
    %c0_i32_1 = arith.constant 0 : i32
    return %c0_i32, %c0_i32_0 : i32, i32
  }
  func.func @transform_3(%arg0: i32) -> (i32, i32) {
    %c0_i32 = arith.constant 0 : i32
    %c0_i32_0 = arith.constant 0 : i32
    %c0_i32_1 = arith.constant 0 : i32
    return %c0_i32, %c0_i32_0 : i32, i32
  }
  func.func @transform_4(%arg0: i32) -> (i32, i32) {
    %c0_i32 = arith.constant 0 : i32
    %c0_i32_0 = arith.constant 0 : i32
    return %arg0, %c0_i32 : i32, i32
  }
  func.func @transform_5(%arg0: i32) -> (i32, i32, i32) {
    %c0_i32 = arith.constant 0 : i32
    %c0_i32_0 = arith.constant 0 : i32
    %c0_i32_1 = arith.constant 0 : i32
    return %arg0, %c0_i32, %c0_i32_0 : i32, i32, i32
  }
  func.func @transform_6(%arg0: i32) -> (i32, i32, i32) {
    %c0_i32 = arith.constant 0 : i32
    %c0_i32_0 = arith.constant 0 : i32
    %c0_i32_1 = arith.constant 0 : i32
    return %arg0, %c0_i32, %c0_i32_0 : i32, i32, i32
  }
}

module attributes {stable_mosaic.version = 11 : i64} {
  func.func @_bn_relu_l2_kernel(%arg0: i32, %arg1: memref<8x32xf32, #tpu.memory_space<vmem>>, %arg2: memref<1x32xf32, #tpu.memory_space<vmem>>, %arg3: memref<1x32xf32, #tpu.memory_space<vmem>>, %arg4: memref<1x32xf32, #tpu.memory_space<vmem>>, %arg5: memref<1xf32, #tpu.memory_space<smem>>, %arg6: memref<8x1xf32, #tpu.memory_space<vmem>>) attributes {dimension_semantics = [#tpu.dimension_semantics<parallel>], iteration_bounds = array<i64: 1>, scalar_prefetch = 0 : i64, scratch_operands = 0 : i64, tpu.core_type = #tpu.core_type<tc>, window_params = [{transform_indices = @transform_0, window_bounds = array<i64: 8, 32>}, {pipeline_mode = #tpu.pipeline_mode<synchronous>, transform_indices = @transform_1, window_bounds = array<i64: 1, 32>}, {pipeline_mode = #tpu.pipeline_mode<synchronous>, transform_indices = @transform_2, window_bounds = array<i64: 1, 32>}, {pipeline_mode = #tpu.pipeline_mode<synchronous>, transform_indices = @transform_3, window_bounds = array<i64: 1, 32>}, {transform_indices = @transform_4, window_bounds = array<i64: 1>}, {transform_indices = @transform_5, window_bounds = array<i64: 8, 1>}]} {
    %c0 = arith.constant 0 : index
    %c0_0 = arith.constant 0 : index
    %0 = vector.load %arg1[%c0, %c0_0] : memref<8x32xf32, #tpu.memory_space<vmem>>, vector<8x32xf32>
    %c0_1 = arith.constant 0 : index
    %c0_2 = arith.constant 0 : index
    %1 = vector.load %arg2[%c0_1, %c0_2] : memref<1x32xf32, #tpu.memory_space<vmem>>, vector<1x32xf32>
    %2 = vector.broadcast %1 : vector<1x32xf32> to vector<8x32xf32>
    %3 = arith.mulf %0, %2 : vector<8x32xf32>
    %c0_3 = arith.constant 0 : index
    %c0_4 = arith.constant 0 : index
    %4 = vector.load %arg3[%c0_3, %c0_4] : memref<1x32xf32, #tpu.memory_space<vmem>>, vector<1x32xf32>
    %5 = vector.broadcast %4 : vector<1x32xf32> to vector<8x32xf32>
    %6 = arith.addf %3, %5 : vector<8x32xf32>
    %cst = arith.constant 0.000000e+00 : f32
    %7 = vector.broadcast %cst : f32 to vector<8x32xf32>
    %8 = arith.maximumf %6, %7 : vector<8x32xf32>
    %c0_5 = arith.constant 0 : index
    %c0_6 = arith.constant 0 : index
    %9 = vector.load %arg4[%c0_5, %c0_6] : memref<1x32xf32, #tpu.memory_space<vmem>>, vector<1x32xf32>
    %10 = vector.broadcast %9 : vector<1x32xf32> to vector<8x32xf32>
    %11 = arith.mulf %8, %10 : vector<8x32xf32>
    %cst_7 = arith.constant dense<0.000000e+00> : vector<8xf32>
    %12 = vector.multi_reduction <add>, %11, %cst_7 [1] : vector<8x32xf32> to vector<8xf32>
    %13 = vector.shape_cast %12 : vector<8xf32> to vector<8x1xf32>
    %c0_8 = arith.constant 0 : index
    %14 = memref.load %arg5[%c0_8] : memref<1xf32, #tpu.memory_space<smem>>
    %15 = vector.broadcast %14 : f32 to vector<8x1xf32>
    %16 = arith.addf %13, %15 : vector<8x1xf32>
    %c0_9 = arith.constant 0 : index
    %c0_10 = arith.constant 0 : index
    %17 = vector.load %arg6[%c0_9, %c0_10] : memref<8x1xf32, #tpu.memory_space<vmem>>, vector<8x1xf32>
    tpu.vector_store %arg6[%c0_9, %c0_10], %16 {strides = array<i32>} : memref<8x1xf32, #tpu.memory_space<vmem>>, vector<8x1xf32>,
    return
  }
  func.func @transform_0(%arg0: i32) -> (i32, i32) {
    %c0_i32 = arith.constant 0 : i32
    %c0_i32_0 = arith.constant 0 : i32
    return %arg0, %c0_i32 : i32, i32
  }
  func.func @transform_1(%arg0: i32) -> (i32, i32) {
    %c0_i32 = arith.constant 0 : i32
    %c0_i32_0 = arith.constant 0 : i32
    %c0_i32_1 = arith.constant 0 : i32
    return %c0_i32, %c0_i32_0 : i32, i32
  }
  func.func @transform_2(%arg0: i32) -> (i32, i32) {
    %c0_i32 = arith.constant 0 : i32
    %c0_i32_0 = arith.constant 0 : i32
    %c0_i32_1 = arith.constant 0 : i32
    return %c0_i32, %c0_i32_0 : i32, i32
  }
  func.func @transform_3(%arg0: i32) -> (i32, i32) {
    %c0_i32 = arith.constant 0 : i32
    %c0_i32_0 = arith.constant 0 : i32
    %c0_i32_1 = arith.constant 0 : i32
    return %c0_i32, %c0_i32_0 : i32, i32
  }
  func.func @transform_4(%arg0: i32) -> i32 {
    %c0_i32 = arith.constant 0 : i32
    %c0_i32_0 = arith.constant 0 : i32
    return %c0_i32 : i32
  }
  func.func @transform_5(%arg0: i32) -> (i32, i32) {
    %c0_i32 = arith.constant 0 : i32
    %c0_i32_0 = arith.constant 0 : i32
    return %arg0, %c0_i32 : i32, i32
  }
}

</mosaic_0001>

<bundles_post_ra>
// kernel: cat_linear_forward.3
= control target key start
LH: loop header
LB: loop body
LE: loop exit
PB: predicated region body
PF: predicated region fallthrough
CT: control target
= control target key end

     0   :  { %vm47_vm0 = vcmask 261120   ;;  %vm54_vm1 = vcmask 7168   ;;  %s111_s0 = inlined_call_operand.vmem [shape: f32[8,32], index: 0, kind: input, shape index: {}]   ;;  %s112_s1 = inlined_call_operand.vmem [shape: f32[1,32], index: 1, kind: input, shape index: {}]   ;;  %s113_s2 = inlined_call_operand.vmem [shape: f32[1,32], index: 2, kind: input, shape index: {}]   ;;  %s114_s3 = inlined_call_operand.vmem [shape: f32[1,32], index: 3, kind: input, shape index: {}]   ;;  %s115_s4 = inlined_call_operand.<no memory space> [shape: f32[1], index: 4, kind: input, shape index: {}]   ;;  %s116_s5 = inlined_call_operand.vmem [shape: f32[8,1], index: 5, kind: output, shape index: {}]  }
   0x1   :  { %v21_v0 = vld [vmem:[%s111_s0] sm:$0xff]  ;;  %v52_v9 = vstv %s115_s4 }
   0x2   :  { %v60_v1 = vld [vmem:[%s112_s1] ss:$0 sm:$0xff] }
   0x3   :  { %v61_v2 = vld [vmem:[%s113_s2] ss:$0 sm:$0xff]  ;;  %v29_v3 = vmul.f32 %v60_v1, %v21_v0 }
   0x4   :  { %v62_v5 = vld [vmem:[%s114_s3] ss:$0 sm:$0xff] }
   0x5   :  { %v37_v4 = vadd.f32 %v61_v2, %v29_v3 }
   0x7   :  { %v38_v6 = vmax.f32 %v37_v4, 0.0 }
   0x9   :  { %v46_v7 = vmul.f32 %v62_v5, %v38_v6 }
   0xb   :  { %v48_v8 = vsel %vm47_vm0, %v46_v7, 0.0 }
   0xc   :  { %49 = vadd.xlane.f32.xlu0 %v48_v8 }
  0x95   :  { %v50_v10 = vpop.xlane.xlu0 %49 }
  0x96   :  { %v53_v11 = vadd.f32 %v52_v9, %v50_v10 }
  0x98   :  { %55 = vst.msk [vmem:[%s116_s5] sm:$0xff] %vm54_vm1, %v53_v11 }

// kernel: cat_linear_forward.2
= control target key start
LH: loop header
LB: loop body
LE: loop exit
PB: predicated region body
PF: predicated region fallthrough
CT: control target
= control target key end

     0   :  { %v343_v0 = vmov 0.0   ;;  %vm344_vm0 = vmmov 0   ;;  %vm25_vm1 = vcmask 261120   ;;  %v99_v6 = vlaneseq  ;;  %s427_s2 = inlined_call_operand.vmem [shape: f32[32,32], index: 2, kind: input, shape index: {}]   ;;  %s428_s0 = inlined_call_operand.vmem [shape: f32[2,32], index: 0, kind: input, shape index: {}]   ;;  %s429_s3 = inlined_call_operand.vmem [shape: f32[32,32], index: 3, kind: input, shape index: {}]   ;;  %s430_s1 = inlined_call_operand.vmem [shape: f32[8,32], index: 1, kind: input, shape index: {}]   ;;  %s431_s4 = inlined_call_operand.vmem [shape: f32[8,32], index: 4, kind: output, shape index: {0}]   ;;  %s432_s5 = inlined_call_operand.vmem [shape: f32[1,1,32], index: 5, kind: output, shape index: {1}]   ;;  %s433_s6 = inlined_call_operand.vmem [shape: f32[1,1,32], index: 6, kind: output, shape index: {2}]  }
   0x1   :  { %314 = vmatprep.subr.mxu0 %v343_v0  ;;  %v24_v1 = vld [vmem:[%s427_s2 + $0x18] sm:$0xff]  ;;  %v23_v2 = vld [vmem:[%s427_s2 + $0x10] sm:$0xff]  ;;  %322 = vmatprep.mubr.msk.f32.mxu0 %vm344_vm0, %v343_v0  ;;  %v22_v3 = vld [vmem:[%s427_s2 + $0x8] sm:$0xff]  ;;  %vm114_vm5 = vcmask 1041408   ;;  %vm110_vm6 = vcmask 15360   ;;  %vm274_vm7 = vcmask 253952  }
   0x2   :  { %315 = vmatpush3.msra.mxu0 %v24_v1  ;;  %325 = vmatprep.subr.mxu1 %v343_v0  ;;  %v21_v4 = vld [vmem:[%s427_s2] sm:$0xff]  ;;  %v102_v7 = vand.u32 127, %v99_v6  ;;  %v100_v9 = vshrl.u32 %v99_v6, 7  ;;  %v192_v13 = vld [vmem:[%s429_s3 + $0x18] sm:$0xff]  ;;  %v191_v15 = vld [vmem:[%s429_s3 + $0x10] sm:$0xff] }
   0x3   :  { %316 = vmatprep.subr.mxu0 %v343_v0  ;;  %327 = vmatprep.mubr.msk.f32.mxu1 %vm344_vm0, %v343_v0  ;;  %v20_v5 = vld [vmem:[%s428_s0] sm:$0x3]  ;;  %v190_v16 = vld [vmem:[%s429_s3 + $0x8] sm:$0xff] }
   0x4   :  { %317 = vmatpush3.msra.mxu0 %v23_v2  ;;  %v103_v8 = vmul.u32 4, %v102_v7  ;;  %v189_v17 = vld [vmem:[%s429_s3] sm:$0xff] }
   0x5   :  { %318 = vmatprep.subr.mxu0 %v343_v0  ;;  %v188_v18 = vld [vmem:[%s430_s1] sm:$0xff] }
   0x6   :  { %319 = vmatpush3.msra.mxu0 %v22_v3  ;;  %v105_v10 = vadd.s32 4, %v103_v8  ;;  %vm104_vm2 = vcmp.ge.s32.totalorder %v100_v9, %v103_v8 }
   0x7   :  { %320 = vmatprep.subr.mxu0 %v343_v0 }
   0x8   :  { %321 = vmatpush3.msra.mxu0 %v21_v4  ;;  %vm106_vm3 = vcmp.lt.s32.totalorder %v100_v9, %v105_v10 }
   0x9   :  { %323 = vmatmul.mubr.msk.f32.vlgmr.msra.gmra.mxu0 %vm25_vm1, %v20_v5  ;;  %vm107_vm4 = vmand %vm104_vm2, %vm106_vm3 }
   0xa   :  { %v298_v11 = vsel %vm107_vm4, 1.0, %v343_v0 }
  0xc9   :  { %v95_v12 = vpop.f32.mrf.mxu0 }
  0xca   :  { %326 = vmatpush3.msk.msra.mxu1 %vm114_vm5, %v95_v12 }
  0xcb   :  { %v324_v14 = vpop.f32.mrf.mxu0  ;;  %328 = vmatmul.mubr.msk.f32.vlgmr.msra.gmra.mxu1 %vm110_vm6, %v298_v11  ;;  %330 = vmatprep.subr.mxu1 %v343_v0 }
  0xcc   :  { %331 = vmatpush3.msra.mxu1 %v192_v13  ;;  %338 = vmatprep.mubr.msk.f32.mxu1 %vm344_vm0, %v343_v0 }
  0xcd   :  { %332 = vmatprep.subr.mxu1 %v343_v0 }
  0xce   :  { %333 = vmatpush3.msra.mxu1 %v191_v15 }
  0xcf   :  { %334 = vmatprep.subr.mxu1 %v343_v0 }
  0xd0   :  { %335 = vmatpush3.msra.mxu1 %v190_v16 }
  0xd1   :  { %336 = vmatprep.subr.mxu1 %v343_v0 }
  0xd2   :  { %337 = vmatpush3.msra.mxu1 %v189_v17 }
  0xd3   :  { %339 = vmatmul.mubr.msk.f32.vlgmr.msra.gmra.mxu1 %vm25_vm1, %v188_v18 }
 0x18b   :  { %v184_v19 = vpop.f32.mrf.mxu1 }
 0x18d   :  { %v329_v20 = vpop.f32.mrf.mxu1 }
 0x193   :  { %v262_v21 = vpop.f32.mrf.mxu1 }
 0x194   :  { %v263_v22 = vadd.f32 %v262_v21, %v184_v19 }
 0x195   :  { %v340_v23 = vpop.f32.mrf.mxu1 }
 0x196   :  { %266 = vst.msk [vmem:[%s431_s4] sm:$0xff] %vm25_vm1, %v263_v22  ;;  %v267_v24 = vsel %vm25_vm1, %v263_v22, 0.0  ;;  %v276_v25 = vmul.f32 %v263_v22, %v263_v22 }
 0x197   :  { %v268_v26 = vrot.slane %v267_v24, 4 }
 0x198   :  { %v277_v27 = vsel %vm25_vm1, %v276_v25, 0.0 }
 0x199   :  { %v269_v28 = vadd.f32 %v268_v26, %v267_v24  ;;  %v278_v29 = vrot.slane %v277_v27, 4 }
 0x19b   :  { %v270_v30 = vrot.slane %v269_v28, 2  ;;  %v279_v31 = vadd.f32 %v278_v29, %v277_v27 }
 0x19d   :  { %v271_v32 = vadd.f32 %v270_v30, %v269_v28  ;;  %v280_v33 = vrot.slane %v279_v31, 2 }
 0x19f   :  { %v272_v34 = vrot.slane %v271_v32, 1  ;;  %v281_v35 = vadd.f32 %v280_v33, %v279_v31 }
 0x1a1   :  { %v273_v36 = vadd.f32 %v272_v34, %v271_v32  ;;  %v282_v37 = vrot.slane %v281_v35, 1 }
 0x1a3   :  { %275 = vst.msk [vmem:[%s432_s5] sm:$0x1] %vm274_vm7, %v273_v36  ;;  %v283_v38 = vadd.f32 %v282_v37, %v281_v35 }
 0x1a5   :  { %284 = vst.msk [vmem:[%s433_s6] sm:$0x1] %vm274_vm7, %v283_v38 }

</bundles_post_ra>
